<compile_context>
chip_gen: v7x
topology: tpu7x:2x2x1
jax: 0.10.0
libtpu: 0.0.40
codegen_flags: <defaults>
</compile_context>

<pallas_src>
import jax
import jax.numpy as jnp
from jax.experimental import pallas as pl
from jax.experimental.pallas import tpu as pltpu


def _round_up(x, m):
    return (x + m - 1) // m * m


def _gather_kernel(idx_ref, table_hbm, out_ref, sems):
    # idx_ref   : (N_pad,) int32 in SMEM (scalar prefetch)
    # table_hbm : (V, Dp)  in HBM (raw ref, manual DMA)
    # out_ref   : (tn, Dp) VMEM output block for this grid step
    # sems      : (nsem,)  DMA semaphores (ring -> bounds in-flight DMAs)
    i = pl.program_id(0)
    tn = out_ref.shape[0]
    nsem = sems.shape[0]
    base = i * tn

    def row_copy(t):
        row = idx_ref[base + t]
        return pltpu.make_async_copy(
            table_hbm.at[pl.ds(row, 1), :],   # one embedding row in HBM
            out_ref.at[pl.ds(t, 1), :],       # its slot in the output tile
            sems.at[t % nsem],
        )

    # Prime the ring: start the first `nsem` row fetches.
    @pl.loop(0, min(nsem, tn))
    def _prime(t):
        row_copy(t).start()

    # Steady state: wait on row t, immediately issue row t + nsem.
    @pl.loop(0, tn)
    def _drain(t):
        row_copy(t).wait()

        @pl.when(t + nsem < tn)
        def _():
            row_copy(t + nsem).start()


def ingredient_embedding(x, table, *, tn=128, nsem=8):
    """Pallas equivalent of IngredientEmbedding.forward: table[x].

    x:     (B, S) integer indices
    table: (V, D) embedding weights
    returns (B, S, D) with the dtype of `table`.
    """
    B, S = x.shape
    V, D = table.shape
    N = B * S

    # Lane-dense embedding dim (pad to a multiple of 128 lanes).
    Dp = _round_up(D, 128)
    # Token tile: 128+ for real workloads, clamped (multiple of 8) for tiny N.
    tn = _round_up(max(8, min(tn, N)), 8)
    N_pad = _round_up(N, tn)
    nsem = max(1, min(nsem, tn))

    # Indices -> SMEM scalar-prefetch operand. Clamp so a bad index can never
    # trigger an out-of-bounds DMA.
    # TODO(synk): nn.Embedding raises on out-of-range indices; here we clamp.
    idx = jnp.clip(x.reshape(N).astype(jnp.int32), 0, V - 1)
    idx = jnp.pad(idx, (0, N_pad - N))

    table_p = table if Dp == D else jnp.pad(table, ((0, 0), (0, Dp - D)))
    itemsize = jnp.dtype(table.dtype).itemsize

    out = pl.pallas_call(
        _gather_kernel,
        out_shape=jax.ShapeDtypeStruct((N_pad, Dp), table.dtype),
        grid_spec=pltpu.PrefetchScalarGridSpec(
            num_scalar_prefetch=1,
            grid=(N_pad // tn,),
            in_specs=[pl.BlockSpec(memory_space=pl.ANY)],           # table stays in HBM
            out_specs=pl.BlockSpec((tn, Dp), lambda i, idx_ref: (i, 0)),
            scratch_shapes=[pltpu.SemaphoreType.DMA((nsem,))],
        ),
        compiler_params=pltpu.CompilerParams(
            dimension_semantics=("parallel",),
        ),
        cost_estimate=pl.CostEstimate(
            flops=0,
            transcendentals=0,
            bytes_accessed=2 * N_pad * Dp * itemsize,  # gathered rows + output
        ),
    )(idx, table_p)

    return out[:N, :D].reshape(B, S, D)


if __name__ == "__main__":
    # Shapes consistent with the module's forward:
    # x: (batch_size, sequence_length) int -> (batch, seq, embedding_dim)
    B, S = 2, 8
    VOCAB, DIM = 64, 32

    key = jax.random.PRNGKey(0)
    k_tab, k_idx = jax.random.split(key)

    # nn.Embedding default init: weights ~ N(0, 1)
    table = jax.random.normal(k_tab, (VOCAB, DIM), dtype=jnp.float32)
    x = jax.random.randint(k_idx, (B, S), 0, VOCAB, dtype=jnp.int32)

    out = ingredient_embedding(x, table)
    out = jax.block_until_ready(out)

    # Reference: plain gather, identical to PyTorch nn.Embedding(x)
    ref = jnp.take(table, x, axis=0)
    assert out.shape == (B, S, DIM)
    assert jnp.array_equal(out, ref), "mismatch vs reference gather"

    print("KERNEL_OK")
</pallas_src>

<mosaic_0001>
module attributes {stable_mosaic.version = 11 : i64} {
  func.func @_gather_kernel(%arg0: i32, %arg1: memref<16xi32, #tpu.memory_space<smem>>, %arg2: memref<64x128xf32, #tpu.memory_space<any>>, %arg3: memref<16x128xf32, #tpu.memory_space<vmem>>, %arg4: memref<8x!tpu.dma_semaphore, #tpu.memory_space<semaphore_mem>>) attributes {dimension_semantics = [#tpu.dimension_semantics<parallel>], iteration_bounds = array<i64: 1>, scalar_prefetch = 1 : i64, scratch_operands = 1 : i64, tpu.core_type = #tpu.core_type<tc>, window_params = [{}, {transform_indices = @transform_1, window_bounds = array<i64: 16, 128>}]} {
    %c16_i32 = arith.constant 16 : i32
    %0 = arith.muli %arg0, %c16_i32 : i32
    %c0_i32 = arith.constant 0 : i32
    %c8_i32 = arith.constant 8 : i32
    %1 = arith.addi %c0_i32, %c8_i32 : i32
    %c1_i32 = arith.constant 1 : i32
    scf.for %arg5 = %c0_i32 to %1 step %c1_i32  : i32 {
      %c1_i32_5 = arith.constant 1 : i32
      %3 = arith.muli %arg5, %c1_i32_5 : i32
      %c0_i32_6 = arith.constant 0 : i32
      %4 = arith.addi %c0_i32_6, %3 : i32
      %5 = arith.addi %0, %4 : i32
      %6 = arith.index_cast %5 : i32 to index
      %7 = memref.load %arg1[%6] : memref<16xi32, #tpu.memory_space<smem>>
      %c8_i32_7 = arith.constant 8 : i32
      %c0_i32_8 = arith.constant 0 : i32
      %8 = arith.cmpi eq, %c8_i32_7, %c0_i32_8 : i32
      %c1_i32_9 = arith.constant 1 : i32
      %9 = arith.select %8, %c1_i32_9, %c8_i32_7 : i32
      %10 = arith.remsi %4, %9 : i32
      %c0_i32_10 = arith.constant 0 : i32
      %11 = arith.cmpi ne, %10, %c0_i32_10 : i32
      %c0_i32_11 = arith.constant 0 : i32
      %12 = arith.cmpi slt, %10, %c0_i32_11 : i32
      %c0_i32_12 = arith.constant 0 : i32
      %13 = arith.cmpi slt, %9, %c0_i32_12 : i32
      %14 = arith.xori %12, %13 : i1
      %15 = arith.andi %14, %11 : i1
      %16 = arith.addi %10, %9 : i32
      %17 = arith.select %15, %16, %10 : i32
      %c0_i32_13 = arith.constant 0 : i32
      %18 = tpu.memref_slice %arg2[%7, %c0_i32_13] : memref<64x128xf32, #tpu.memory_space<any>> -> memref<1x128xf32, #tpu.memory_space<any>>
      %c0_i32_14 = arith.constant 0 : i32
      %19 = tpu.memref_slice %arg3[%4, %c0_i32_14] : memref<16x128xf32, #tpu.memory_space<vmem>> -> memref<1x128xf32, #tpu.memory_space<vmem>>
      %20 = tpu.memref_slice %arg4[%17] : memref<8x!tpu.dma_semaphore, #tpu.memory_space<semaphore_mem>> -> memref<1x!tpu.dma_semaphore, #tpu.memory_space<semaphore_mem>>
      %21 = tpu.memref_squeeze %20 : memref<1x!tpu.dma_semaphore, #tpu.memory_space<semaphore_mem>> -> memref<!tpu.dma_semaphore, #tpu.memory_space<semaphore_mem>>
      tpu.enqueue_dma source(%18 : memref<1x128xf32, #tpu.memory_space<any>>) target(%19 : memref<1x128xf32, #tpu.memory_space<vmem>>) target_semaphore(%21 : memref<!tpu.dma_semaphore, #tpu.memory_space<semaphore_mem>>)
    }
    %c8_i32_0 = arith.constant 8 : i32
    %c0_i32_1 = arith.constant 0 : i32
    %c16_i32_2 = arith.constant 16 : i32
    %2 = arith.addi %c0_i32_1, %c16_i32_2 : i32
    %c1_i32_3 = arith.constant 1 : i32
    scf.for %arg5 = %c0_i32_1 to %2 step %c1_i32_3  : i32 {
      %c1_i32_5 = arith.constant 1 : i32
      %3 = arith.muli %arg5, %c1_i32_5 : i32
      %c0_i32_6 = arith.constant 0 : i32
      %4 = arith.addi %c0_i32_6, %3 : i32
      %5 = arith.addi %0, %4 : i32
      %6 = arith.index_cast %5 : i32 to index
      %7 = memref.load %arg1[%6] : memref<16xi32, #tpu.memory_space<smem>>
      %c8_i32_7 = arith.constant 8 : i32
      %c0_i32_8 = arith.constant 0 : i32
      %8 = arith.cmpi eq, %c8_i32_7, %c0_i32_8 : i32
      %c1_i32_9 = arith.constant 1 : i32
      %9 = arith.select %8, %c1_i32_9, %c8_i32_7 : i32
      %10 = arith.remsi %4, %9 : i32
      %c0_i32_10 = arith.constant 0 : i32
      %11 = arith.cmpi ne, %10, %c0_i32_10 : i32
      %c0_i32_11 = arith.constant 0 : i32
      %12 = arith.cmpi slt, %10, %c0_i32_11 : i32
      %c0_i32_12 = arith.constant 0 : i32
      %13 = arith.cmpi slt, %9, %c0_i32_12 : i32
      %14 = arith.xori %12, %13 : i1
      %15 = arith.andi %14, %11 : i1
      %16 = arith.addi %10, %9 : i32
      %17 = arith.select %15, %16, %10 : i32
      %c0_i32_13 = arith.constant 0 : i32
      %18 = tpu.memref_slice %arg2[%7, %c0_i32_13] : memref<64x128xf32, #tpu.memory_space<any>> -> memref<1x128xf32, #tpu.memory_space<any>>
      %c0_i32_14 = arith.constant 0 : i32
      %19 = tpu.memref_slice %arg3[%4, %c0_i32_14] : memref<16x128xf32, #tpu.memory_space<vmem>> -> memref<1x128xf32, #tpu.memory_space<vmem>>
      %20 = tpu.memref_slice %arg4[%17] : memref<8x!tpu.dma_semaphore, #tpu.memory_space<semaphore_mem>> -> memref<1x!tpu.dma_semaphore, #tpu.memory_space<semaphore_mem>>
      %21 = tpu.memref_squeeze %20 : memref<1x!tpu.dma_semaphore, #tpu.memory_space<semaphore_mem>> -> memref<!tpu.dma_semaphore, #tpu.memory_space<semaphore_mem>>
      tpu.wait_dma2 semaphore(%21 : memref<!tpu.dma_semaphore, #tpu.memory_space<semaphore_mem>>) src(%18 : memref<1x128xf32, #tpu.memory_space<any>>) dst(%19 : memref<1x128xf32, #tpu.memory_space<vmem>>)
      %c8_i32_15 = arith.constant 8 : i32
      %22 = arith.addi %4, %c8_i32_15 : i32
      %c16_i32_16 = arith.constant 16 : i32
      %23 = arith.cmpi slt, %22, %c16_i32_16 : i32
      %24 = arith.extui %23 : i1 to i32
      %c0_i32_17 = arith.constant 0 : i32
      %25 = arith.cmpi ne, %24, %c0_i32_17 : i32
      scf.if %25 {
        %c8_i32_18 = arith.constant 8 : i32
        %26 = arith.addi %4, %c8_i32_18 : i32
        %27 = arith.addi %0, %26 : i32
        %28 = arith.index_cast %27 : i32 to index
        %29 = memref.load %arg1[%28] : memref<16xi32, #tpu.memory_space<smem>>
        %c8_i32_19 = arith.constant 8 : i32
        %c0_i32_20 = arith.constant 0 : i32
        %30 = arith.cmpi eq, %c8_i32_19, %c0_i32_20 : i32
        %c1_i32_21 = arith.constant 1 : i32
        %31 = arith.select %30, %c1_i32_21, %c8_i32_19 : i32
        %32 = arith.remsi %26, %31 : i32
        %c0_i32_22 = arith.constant 0 : i32
        %33 = arith.cmpi ne, %32, %c0_i32_22 : i32
        %c0_i32_23 = arith.constant 0 : i32
        %34 = arith.cmpi slt, %32, %c0_i32_23 : i32
        %c0_i32_24 = arith.constant 0 : i32
        %35 = arith.cmpi slt, %31, %c0_i32_24 : i32
        %36 = arith.xori %34, %35 : i1
        %37 = arith.andi %36, %33 : i1
        %38 = arith.addi %32, %31 : i32
        %39 = arith.select %37, %38, %32 : i32
        %c0_i32_25 = arith.constant 0 : i32
        %40 = tpu.memref_slice %arg2[%29, %c0_i32_25] : memref<64x128xf32, #tpu.memory_space<any>> -> memref<1x128xf32, #tpu.memory_space<any>>
        %c0_i32_26 = arith.constant 0 : i32
        %41 = tpu.memref_slice %arg3[%26, %c0_i32_26] : memref<16x128xf32, #tpu.memory_space<vmem>> -> memref<1x128xf32, #tpu.memory_space<vmem>>
        %42 = tpu.memref_slice %arg4[%39] : memref<8x!tpu.dma_semaphore, #tpu.memory_space<semaphore_mem>> -> memref<1x!tpu.dma_semaphore, #tpu.memory_space<semaphore_mem>>
        %43 = tpu.memref_squeeze %42 : memref<1x!tpu.dma_semaphore, #tpu.memory_space<semaphore_mem>> -> memref<!tpu.dma_semaphore, #tpu.memory_space<semaphore_mem>>
        tpu.enqueue_dma source(%40 : memref<1x128xf32, #tpu.memory_space<any>>) target(%41 : memref<1x128xf32, #tpu.memory_space<vmem>>) target_semaphore(%43 : memref<!tpu.dma_semaphore, #tpu.memory_space<semaphore_mem>>)
      } else {
      }
    }
    %c16_i32_4 = arith.constant 16 : i32
    return
  }
  func.func @transform_1(%arg0: i32, %arg1: memref<16xi32, #tpu.memory_space<smem>>) -> (i32, i32) {
    %c0_i32 = arith.constant 0 : i32
    %c0_i32_0 = arith.constant 0 : i32
    return %arg0, %c0_i32 : i32, i32
  }
}

</mosaic_0001>

<bundles_post_ra>
// kernel: tpu_custom_call.1
= control target key start
LH: loop header
LB: loop body
LE: loop exit
PB: predicated region body
PF: predicated region fallthrough
CT: control target
= control target key end

     0   :  { %s473_s0 = inlined_call_operand.hbm [shape: s32[16], index: 0, kind: input, shape index: {}]   ;;  %s474_s1 = inlined_call_operand.hbm [shape: f32[64,128], index: 1, kind: input, shape index: {}]   ;;  %s475_s2 = inlined_call_operand.hbm [shape: f32[16,128], index: 2, kind: output, shape index: {}]  }
   0x1   :  { %s242_s11 = scalar_lea.hbm %s473_s0, 16 }
   0x2   :  { %p243_p0 = scmp.ne.s32.totalorder %s473_s0, %s242_s11  ;;  %p246_p1 = scmp.lt.u32.totalorder %s242_s11, %s473_s0 }
   0x4   :  { %p248_p2 = pnand %p246_p1, %p243_p0 }
   0x6   :  { %251 = shalt.err (!%p248_p2)  }
   0x7   :  { %s348_s16 = smov [#allocation4]  }
   0x8   :  { %8 = dma.hbm_to_smem %s473_s0, 16, %s348_s16, [#allocation3] }
   0x9   :  { %334 = dma.done.wait [#allocation3], 16 }
   0xa   :  { %335 = vsyncadd [#allocation3], 4294967280 }
   0xb   :  { %10 = sfence }
   0xc   :  { %11 = vsyncpa [#allocation6], 0  ;;  %s379_s19 = smov 0  }
   0xd LB: > { %s20_s20 = sld [smem:[#allocation4 + %s342_s19]]  ;;  %p21_p3 = scmp.lt.s32.totalorder %s342_s19, 0  ;;  %s342_s19 = sphi %s379_s19, %s18_s19  }
   0xe   : > { %s22_s21 = ssub.s32 0, %s342_s19  ;;  %s35_s24 = scalar_lea.vmem [#allocation5], %s342_s19 }
   0xf   : > { %s197_s0 = smin.u32 %s342_s19, %s22_s21  ;;  %s44_s25 = sshll.u32 %s35_s24, 4  ;;  %s45_s25 = int_to_ptr.vmem [resolvable:$true] %s44_s25 }
  0x10   : > { %s24_s22 = sand.u32 7, %s197_s0   ;;  %s254_s7 = scalar_lea.hbm %s474_s1, 1024 }
  0x11   : > { %s25_s23 = ssub.s32 0, %s24_s22 }
  0x12   : > { %s477_s23 = smov (!%p21_p3, %s25_s23), %s24_s22 }
  0x13   : > { %s200_s26 = sshll.u32 %s20_s20, 4  ;;  %p199_p4 = scmp.lt.s32.totalorder %s477_s23, 0 }
  0x14   : > { %s31_s27 = sadd.s32 8, %s477_s23  ;;  %s34_s30 = scalar_lea.hbm %s474_s1, %s200_s26 }
  0x15   : > { %s479_s27 = smov (!%p199_p4, %s31_s27), %s477_s23  ;;  %s252_s4 = scalar_lea.hbm %s34_s30, 16 }
  0x16   : > { %s36_s3 = scalar_lea.sflag [#allocation2], %s479_s27  ;;  %p253_p5 = scmp.ne.s32.totalorder %s34_s30, %s252_s4 }
  0x17   : > { %p255_p6 = scmp.lt.u32.totalorder %s34_s30, %s474_s1  ;;  %p256_p7 = scmp.lt.u32.totalorder %s254_s7, %s252_s4 }
  0x18   : > { %p258_p9 = scmp.lt.u32.totalorder %s252_s4, %s34_s30 }
  0x19   : > { %p257_p8 = por %p256_p7, %p255_p6 }
  0x1b   : > { %p259_p10 = por %p258_p9, %p257_p8 }
  0x1d   : > { %p260_p11 = pnand %p259_p10, %p253_p5 }
  0x1f   : > { %263 = shalt.err (!%p260_p11)  }
  0x20   : > { %s264_s12 = scalar_lea.vmem %s45_s25, 16  ;;  %s349_s13 = smov [#allocation5]  }
  0x21   : > { %p265_p12 = scmp.ne.s32.totalorder %s45_s25, %s264_s12  ;;  %s266_s14 = sshll.u32 %s349_s13, 4  ;;  %s402_s14 = int_to_ptr.vmem [resolvable:$false] %s266_s14 }
  0x22   : > { %s405_s15 = scalar_lea.vmem %s402_s14, 256  ;;  %p269_p13 = scmp.lt.s32.totalorder %s45_s25, %s402_s14 }
  0x23   : > { %p270_p0 = scmp.lt.s32.totalorder %s405_s15, %s264_s12 }
  0x25   : > { %p271_p1 = por %p270_p0, %p269_p13 }
  0x27   : > { %p272_p2 = pnand %p271_p1, %p265_p12 }
  0x29   : > { %275 = shalt.err (!%p272_p2)  }
  0x2a   : > { %47 = dma.hbm_to_vmem [thread:$0]  %s34_s30, 16, %s45_s25, %s36_s3 }
  0x2b   : > { %s18_s19 = sadd.s32 1, %s342_s19  }
  0x2c   : > { %p15_p3 = scmp.ge.s32.totalorder %s18_s19, 8  }
  0x2d   :  { %s412_s16 = smov (%p15_p3), 0  }
  0x2e   :  { %17 = sbr.rel (!%p15_p3) target bundleno = 13 (0xd), region = 60 }
  0x35 LB: > { %p56_p4 = scmp.lt.s32.totalorder %s346_s16, 0  ;;  %s57_s17 = ssub.s32 0, %s346_s16  ;;  %s346_s16 = sphi %s412_s16, %s53_s16  }
  0x36   : > { %s201_s18 = smin.u32 %s346_s16, %s57_s17 }
  0x37   : > { %s59_s20 = sand.u32 7, %s201_s18  }
  0x38   : > { %s60_s21 = ssub.s32 0, %s59_s20 }
  0x39   : > { %s481_s21 = smov (!%p56_p4, %s60_s21), %s59_s20 }
  0x3a   : > { %p203_p5 = scmp.lt.s32.totalorder %s481_s21, 0  ;;  %s66_s0 = sadd.s32 8, %s481_s21 }
  0x3c   : > { %s483_s0 = smov (!%p203_p5, %s66_s0), %s481_s21 }
  0x3d   : > { %s68_s19 = scalar_lea.sflag [#allocation2], %s483_s0 }
  0x3e   : > { %336 = dma.done.wait %s68_s19, 16 }
  0x3f   : > { %337 = vsyncadd %s68_s19, 4294967280  ;;  %s421_s22 = sadd.s32 8, %s346_s16  ;;  %s184_s30 = scalar_lea.vmem [#allocation5], %s346_s16 }
  0x40   : > { %p221_p6 = scmp.lt.s32.totalorder %s421_s22, 16  ;;  %p79_p7 = scmp.lt.s32.totalorder %s421_s22, 0 }
  0x41   : > { %s80_s23 = ssub.s32 0, %s421_s22  ;;  %s185_s3 = scalar_lea.vmem %s184_s30, 8 [#allocation5] }
  0x42   : > { %s218_s24 = scalar_select %p221_p6, [#allocation4], [#allocation13] }
  0x43   : > { %s219_s25 = scalar_select %p221_p6, %s421_s22, 0 }
  0x44   : > { %s205_s26 = smin.u32 %s80_s23, %s421_s22  ;;  %s102_s4 = sshll.u32 %s185_s3, 4  ;;  %s103_s4 = int_to_ptr.vmem [resolvable:$true] %s102_s4 }
  0x45   : > { %s78_s27 = sld [smem:[%s218_s24 + %s219_s25]]  ;;  %s82_s28 = sand.u32 7, %s205_s26  }
  0x46   : > { %s83_s29 = ssub.s32 0, %s82_s28 }
  0x47   : > { %s485_s29 = smov (!%p79_p7, %s83_s29), %s82_s28 }
  0x48   : > { %p207_p8 = scmp.lt.s32.totalorder %s485_s29, 0  ;;  %s89_s5 = sadd.s32 8, %s485_s29 }
  0x4a   : > { %s487_s5 = smov (!%p207_p8, %s89_s5), %s485_s29 }
  0x4b   : > { %s208_s6 = sshll.u32 %s78_s27, 4  ;;  %s94_s11 = scalar_lea.sflag [#allocation2], %s487_s5 }
  0x4c   : > { %s92_s10 = scalar_lea.hbm %s474_s1, %s208_s6 }
  0x4d   : > { %s276_s12 = scalar_lea.hbm %s92_s10, 16  ;;  %p281_p12 = scmp.lt.u32.totalorder %s92_s10, %s474_s1 }
  0x4e   : > { %p277_p9 = scmp.ne.s32.totalorder %s92_s10, %s276_s12  ;;  %p282_p13 = scmp.lt.u32.totalorder %s254_s7, %s276_s12 }
  0x4f   : > { %p284_p1 = scmp.lt.u32.totalorder %s276_s12, %s92_s10 }
  0x50   : > { %p278_p10 = pnand %p277_p9, %p221_p6  ;;  %p283_p0 = por %p282_p13, %p281_p12 }
  0x52   : > { %p279_p11 = pneg %p278_p10  ;;  %p285_p2 = por %p284_p1, %p283_p0 }
  0x54   : > { %p286_p3 = pnand %p285_p2, %p279_p11 }
  0x56   : > { %289 = shalt.err (!%p286_p3)  }
  0x57   : > { %s290_s21 = scalar_lea.vmem %s103_s4, 16  ;;  %p297_p8 = scmp.lt.s32.totalorder %s103_s4, %s402_s14 }
  0x58   : > { %p291_p4 = scmp.ne.s32.totalorder %s103_s4, %s290_s21  ;;  %p298_p9 = scmp.lt.s32.totalorder %s405_s15, %s290_s21 }
  0x5a   : > { %p292_p5 = pnand %p291_p4, %p221_p6  ;;  %p299_p10 = por %p298_p9, %p297_p8 }
  0x5c   : > { %p293_p7 = pneg %p292_p5 }
  0x5e   : > { %p300_p12 = pnand %p299_p10, %p293_p7 }
  0x60   : > { %303 = shalt.err (!%p300_p12)  }
  0x61   : > { %220 = dma.hbm_to_vmem [thread:$0]  (%p221_p6), %s92_s10, 16, %s103_s4, %s94_s11 }
  0x62   : > { %s53_s16 = sadd.s32 1, %s346_s16  }
  0x63   : > { %p50_p11 = scmp.ge.s32.totalorder %s53_s16, 16  }
  0x64   :  { %p305_p13 = scmp.ne.s32.totalorder (%p50_p11), %s402_s14, %s405_s15  ;;  %p309_p0 = scmp.lt.s32.totalorder (%p50_p11), %s402_s14, %s402_s14 }
  0x65   :  { %52 = sbr.rel (!%p50_p11) target bundleno = 53 (0x35), region = 71  ;;  %p310_p1 = scmp.lt.s32.totalorder (%p50_p11), %s405_s15, %s405_s15 }
  0x67   :  { %p311_p2 = por (%p50_p11), %p310_p1, %p309_p0 }
  0x69   :  { %p312_p3 = pnand (%p50_p11), %p311_p2, %p305_p13 }
  0x6c   :  { %315 = shalt.err (!%p312_p3)
}
  0x6d   :  { %s316_s22 = scalar_lea.hbm %s475_s2, 256 }
  0x6e   :  { %p317_p6 = scmp.ne.s32.totalorder %s475_s2, %s316_s22  ;;  %p320_p4 = scmp.lt.u32.totalorder %s316_s22, %s475_s2 }
  0x70   :  { %p322_p5 = pnand %p320_p4, %p317_p6 }
  0x72   :  { %325 = shalt.err (!%p322_p5)
}
  0x73   :  { %s350_s16 = smov 128   ;;  %s351_s15 = smov 8  }
  0x74   :  { %117 = dma.vmem_to_hbm [thread:$0]  %s402_s14, 256, %s475_s2, [#allocation6], %s350_s16, %s350_s16, %s351_s15  }
  0x75   :  { %338 = dma.done.wait [#allocation6], 256  }
  0x76   :  { %339 = vsyncadd [#allocation6], 4294967040 }
  0x77   :  { %121 = vsyncpa [#allocation6], 1 }
  0x78   :  { %122 = vsyncmov [#allocation2] }
  0x7b   :  { %s123_s27 = vpop.sfrf %122 }
  0x7c   :  { %p209_p7 = scmp.ne.s32.totalorder %s123_s27, 0 }
  0x7e   :  { %127 = shalt.err (%p209_p7)  }
  0x7f   :  { %129 = vsyncmov [#allocation2 + $0x1] }
  0x82   :  { %s130_s28 = vpop.sfrf %129 }
  0x83   :  { %p210_p8 = scmp.ne.s32.totalorder %s130_s28, 0 }
  0x85   :  { %134 = shalt.err (%p210_p8)  }
  0x86   :  { %136 = vsyncmov [#allocation2 + $0x2] }
  0x89   :  { %s137_s29 = vpop.sfrf %136 }
  0x8a   :  { %p211_p9 = scmp.ne.s32.totalorder %s137_s29, 0 }
  0x8c   :  { %141 = shalt.err (%p211_p9)  }
  0x8d   :  { %143 = vsyncmov [#allocation2 + $0x3] }
  0x90   :  { %s144_s30 = vpop.sfrf %143 }
  0x91   :  { %p212_p10 = scmp.ne.s32.totalorder %s144_s30, 0 }
  0x93   :  { %148 = shalt.err (%p212_p10)  }
  0x94   :  { %150 = vsyncmov [#allocation2 + $0x4] }
  0x97   :  { %s151_s2 = vpop.sfrf %150 }
  0x98   :  { %p213_p12 = scmp.ne.s32.totalorder %s151_s2, 0 }
  0x9a   :  { %155 = shalt.err (%p213_p12)  }
  0x9b   :  { %157 = vsyncmov [#allocation2 + $0x5] }
  0x9e   :  { %s158_s14 = vpop.sfrf %157 }
  0x9f   :  { %p214_p11 = scmp.ne.s32.totalorder %s158_s14, 0 }
  0xa1   :  { %162 = shalt.err (%p214_p11)  }
  0xa2   :  { %164 = vsyncmov [#allocation2 + $0x6] }
  0xa5   :  { %s165_s3 = vpop.sfrf %164 }
  0xa6   :  { %p215_p13 = scmp.ne.s32.totalorder %s165_s3, 0 }
  0xa8   :  { %169 = shalt.err (%p215_p13)  }
  0xa9   :  { %171 = vsyncmov [#allocation2 + $0x7] }
  0xac   :  { %s172_s4 = vpop.sfrf %171 }
  0xad   :  { %p216_p0 = scmp.ne.s32.totalorder %s172_s4, 0 }
  0xaf   :  { %176 = shalt.err (%p216_p0)  }

</bundles_post_ra>
